<compile_context>
chip_gen: v5e
topology: v5e:2x2
jax: 0.10.0
libtpu: 0.0.40
codegen_flags: <defaults>
</compile_context>

<pallas_src>
import functools

import jax
import jax.numpy as jnp
from jax.experimental import pallas as pl
from jax.experimental.pallas import tpu as pltpu


def _round_up(a, b):
    return ((a + b - 1) // b) * b


def _cdiv(a, b):
    return -(-a // b)


def _conv_kernel(xa_ref, xb_ref, w_ref, b_ref, o_ref, win_ref, patch_ref, *,
                 kernel_size, cin, wp, halo, tm, kkc, activation):
    # xa_ref:    (1, Cin, TM)       flat padded image, lane tile m
    # xb_ref:    (1, Cin, TM)       flat padded image, lane tile m+1 (halo source)
    # w_ref:     (Cout, KKC_pad)    flattened conv weights (bf16, zero-padded columns)
    # b_ref:     (Cout, 1)          f32 bias
    # o_ref:     (1, Cout, TM)      output tile (channel-major, lane-dense)
    # win_ref:   (Cin, TM + halo)   VMEM scratch: stitched input window
    # patch_ref: (KKC_pad, TM)      VMEM scratch: in-kernel im2col patch matrix
    K = kernel_size

    # Stitch the input window for this tile: flat elements [m*TM, m*TM + TM + halo).
    win_ref[:, :tm] = xa_ref[0]
    win_ref[:, tm:tm + halo] = xb_ref[0, :, :halo]

    # In-kernel im2col: each tap (kh, kw) is a static lane-shift of the window.
    kkc_pad = patch_ref.shape[0]
    if kkc_pad > kkc:  # zero the alignment rows every step (cheap, megacore-safe)
        patch_ref[kkc:, :] = jnp.zeros((kkc_pad - kkc, tm), patch_ref.dtype)
    for kh in range(K):
        for kw in range(K):
            off = kh * wp + kw
            r0 = (kh * K + kw) * cin
            patch_ref[r0:r0 + cin, :] = win_ref[:, off:off + tm]

    # One lane-dense MXU matmul over the whole (padded) contraction dim, f32 accumulate.
    acc = jnp.dot(w_ref[...], patch_ref[...], preferred_element_type=jnp.float32)
    acc = acc + b_ref[...]                    # bias broadcasts along the lane axis
    if activation:
        acc = jnp.maximum(acc, 0.0)
    o_ref[0] = acc.astype(o_ref.dtype)


def conv_layer_forward(x_nchw, weight, bias, *, activation=True,
                       compute_dtype=jnp.bfloat16, out_dtype=None,
                       tile_m=2048, vmem_budget_bytes=28 * 1024 * 1024):
    """Forward pass of ConvLayer (Conv2d stride=1, padding=K//2, bias, optional ReLU).

    x_nchw: (N, Cin, H, W)   -- PyTorch NCHW convention
    weight: (Cout, Cin, K, K)
    bias:   (Cout,)
    Returns (N, Cout, H, W) in out_dtype (default: x's dtype).
    """
    N, Cin, H, W = x_nchw.shape
    Cout, Cin_w, K, K2 = weight.shape
    assert Cin_w == Cin and K == K2
    # padding=K//2 only gives true "same" output for odd K (matches module usage).
    assert K % 2 == 1, "ConvLayer translation assumes an odd kernel_size"
    pad = K // 2
    Hp, Wp = H + 2 * pad, W + 2 * pad
    KKC = K * K * Cin
    out_dtype = x_nchw.dtype if out_dtype is None else jnp.dtype(out_dtype)

    # Contraction padding: at least a bf16 sublane pack (16); a full lane tile when large.
    KKC_pad = _round_up(KKC, 16) if KKC < 256 else _round_up(KKC, 128)

    Q = H * Wp                       # flat "padded-width" output domain
    HALO = (K - 1) * Wp + (K - 1)    # extra lanes each tile needs from the next tile

    cbytes = jnp.dtype(compute_dtype).itemsize
    obytes = jnp.dtype(out_dtype).itemsize

    def vmem_estimate(tm):
        return (2 * 2 * Cin * tm * cbytes        # xa + xb blocks, double-buffered
                + 2 * Cout * KKC_pad * cbytes    # resident weights
                + 2 * Cout * 4                   # bias
                + 2 * Cout * tm * obytes         # output block, double-buffered
                + Cin * (tm + HALO) * cbytes     # window scratch
                + KKC_pad * tm * cbytes)         # im2col patch scratch

    # Lane tile: multiple of 128, >= HALO (so the window fits in tile m ++ tile m+1),
    # capped at tile_m and shrunk until it fits the conservative VMEM budget.
    tm_floor = max(_round_up(HALO, 128), 128)
    TM = min(_round_up(tile_m, 128), _round_up(Q, 128))
    TM = max(TM, tm_floor)
    while vmem_estimate(TM) > vmem_budget_bytes and TM - 128 >= tm_floor:
        TM -= 128
    m_tiles = _cdiv(Q, TM)
    if N == 1 and m_tiles == 1 and Q > 128:
        # v7x has 2 TensorCores: make sure the (fully parallel) grid has >= 2 steps.
        TM = max(_round_up(_cdiv(Q, 2), 128), tm_floor)
        m_tiles = _cdiv(Q, TM)
    M_pad = m_tiles * TM
    # Flat input length: all real data + an extra zero tile so block index m+1 always exists.
    L_in = max((m_tiles + 1) * TM, _round_up(Hp * Wp, TM))

    # ---- glue (plain JAX): pad + flatten (free reshape) + cast; repack weights/bias ----
    x_pad = jnp.pad(x_nchw, ((0, 0), (0, 0), (pad, pad), (pad, pad)))
    x_flat = x_pad.reshape(N, Cin, Hp * Wp).astype(compute_dtype)
    x_flat = jnp.pad(x_flat, ((0, 0), (0, 0), (0, L_in - Hp * Wp)))

    # w_mat[co, (kh*K + kw)*Cin + ci] == weight[co, ci, kh, kw]  (matches tap ordering)
    w_mat = jnp.transpose(weight, (0, 2, 3, 1)).reshape(Cout, KKC).astype(compute_dtype)
    if KKC_pad > KKC:
        w_mat = jnp.pad(w_mat, ((0, 0), (0, KKC_pad - KKC)))
    b2d = bias.reshape(Cout, 1).astype(jnp.float32)

    kernel = functools.partial(
        _conv_kernel, kernel_size=K, cin=Cin, wp=Wp, halo=HALO, tm=TM, kkc=KKC,
        activation=activation)

    # Cost estimate uses true (unpadded) quantities.
    flops = 2 * N * H * W * KKC * Cout
    bytes_accessed = (N * Cin * H * W * x_nchw.dtype.itemsize
                      + Cout * KKC * weight.dtype.itemsize
                      + N * Cout * H * W * obytes)

    vmem_limit = int(min(48 * 1024 * 1024,
                         max(2 * vmem_estimate(TM), 16 * 1024 * 1024)))

    out_flat = pl.pallas_call(
        kernel,
        out_shape=jax.ShapeDtypeStruct((N, Cout, M_pad), out_dtype),
        grid_spec=pltpu.PrefetchScalarGridSpec(
            num_scalar_prefetch=0,
            grid=(N, m_tiles),
            in_specs=[
                pl.BlockSpec((1, Cin, TM), lambda n, m: (n, 0, m)),       # tile m
                pl.BlockSpec((1, Cin, TM), lambda n, m: (n, 0, m + 1)),   # halo source
                pl.BlockSpec((Cout, KKC_pad), lambda n, m: (0, 0)),       # weights (resident)
                pl.BlockSpec((Cout, 1), lambda n, m: (0, 0)),             # bias (resident)
            ],
            out_specs=pl.BlockSpec((1, Cout, TM), lambda n, m: (n, 0, m)),
            scratch_shapes=[
                pltpu.VMEM((Cin, TM + HALO), compute_dtype),   # stitched input window
                pltpu.VMEM((KKC_pad, TM), compute_dtype),      # im2col patch matrix
            ],
        ),
        compiler_params=pltpu.CompilerParams(
            dimension_semantics=("parallel", "parallel"),
            vmem_limit_bytes=vmem_limit),
        cost_estimate=pl.CostEstimate(
            flops=flops, transcendentals=0, bytes_accessed=bytes_accessed),
    )(x_flat, x_flat, w_mat, b2d)

    # Drop the tail padding and the 2*pad garbage columns of the padded-width domain.
    out = out_flat[:, :, :Q].reshape(N, Cout, H, Wp)[:, :, :, :W]
    return out


def _reference_forward(x_nchw, weight, bias, *, activation=True):
    """Pure-JAX reference (lax conv, full f32) for correctness check."""
    pad = weight.shape[-1] // 2
    y = jax.lax.conv_general_dilated(
        x_nchw, weight,
        window_strides=(1, 1),
        padding=((pad, pad), (pad, pad)),
        dimension_numbers=("NCHW", "OIHW", "NCHW"),
        precision=jax.lax.Precision.HIGHEST)
    y = y + bias.reshape(1, -1, 1, 1)
    return jnp.maximum(y, 0.0) if activation else y


if __name__ == "__main__":
    key = jax.random.PRNGKey(0)
    k_x, k_w, k_b = jax.random.split(key, 3)

    # Small shapes consistent with the module: batch=2, in_channels=4,
    # out_channels=8, kernel_size=3, spatial 16x16.
    N, Cin, H, W = 2, 4, 16, 16
    Cout, K = 8, 3

    x = jax.random.normal(k_x, (N, Cin, H, W), dtype=jnp.float32)
    fan_in = Cin * K * K
    bound = 1.0 / (fan_in ** 0.5)
    weight = jax.random.uniform(k_w, (Cout, Cin, K, K), jnp.float32, -bound, bound)
    bias = jax.random.uniform(k_b, (Cout,), jnp.float32, -bound, bound)

    out = conv_layer_forward(x, weight, bias, activation=True)
    out = jax.block_until_ready(out)
    assert out.shape == (N, Cout, H, W)

    # Reference with the same bf16 operand quantization (kernel accumulates in f32),
    # so tolerances stay tight while still validating the conv + bias + ReLU logic.
    xq = x.astype(jnp.bfloat16).astype(jnp.float32)
    wq = weight.astype(jnp.bfloat16).astype(jnp.float32)
    ref = _reference_forward(xq, wq, bias, activation=True)
    assert jnp.allclose(out, ref, atol=1e-2, rtol=1e-2), "mismatch vs reference conv"

    print("KERNEL_OK")
</pallas_src>

<mosaic_0001>
module attributes {stable_mosaic.version = 11 : i64} {
  func.func @_conv_kernel(%arg0: i32, %arg1: i32, %arg2: memref<1x4x384xbf16, #tpu.memory_space<vmem>>, %arg3: memref<1x4x384xbf16, #tpu.memory_space<vmem>>, %arg4: memref<8x48xbf16, #tpu.memory_space<vmem>>, %arg5: memref<8x1xf32, #tpu.memory_space<vmem>>, %arg6: memref<1x8x384xf32, #tpu.memory_space<vmem>>, %arg7: memref<4x422xbf16, #tpu.memory_space<vmem>>, %arg8: memref<48x384xbf16, #tpu.memory_space<vmem>>) attributes {dimension_semantics = [#tpu.dimension_semantics<parallel>, #tpu.dimension_semantics<parallel>], iteration_bounds = array<i64: 2, 1>, scalar_prefetch = 0 : i64, scratch_operands = 2 : i64, tpu.core_type = #tpu.core_type<tc>, window_params = [{transform_indices = @transform_0, window_bounds = array<i64: 1, 4, 384>}, {transform_indices = @transform_1, window_bounds = array<i64: 1, 4, 384>}, {pipeline_mode = #tpu.pipeline_mode<synchronous>, transform_indices = @transform_2, window_bounds = array<i64: 8, 48>}, {pipeline_mode = #tpu.pipeline_mode<synchronous>, transform_indices = @transform_3, window_bounds = array<i64: 8, 1>}, {transform_indices = @transform_4, window_bounds = array<i64: 1, 8, 384>}]} {
    %c0 = arith.constant 0 : index
    %c0_0 = arith.constant 0 : index
    %c0_1 = arith.constant 0 : index
    %0 = vector.load %arg2[%c0, %c0_0, %c0_1] : memref<1x4x384xbf16, #tpu.memory_space<vmem>>, vector<1x4x384xbf16>
    %1 = vector.shape_cast %0 : vector<1x4x384xbf16> to vector<4x384xbf16>
    %c0_2 = arith.constant 0 : index
    %c0_3 = arith.constant 0 : index
    %2 = vector.load %arg7[%c0_2, %c0_3] : memref<4x422xbf16, #tpu.memory_space<vmem>>, vector<4x384xbf16>
    tpu.vector_store %arg7[%c0_2, %c0_3], %1 {strides = array<i32>} : memref<4x422xbf16, #tpu.memory_space<vmem>>, vector<4x384xbf16>,
    %c0_4 = arith.constant 0 : index
    %c0_5 = arith.constant 0 : index
    %c0_6 = arith.constant 0 : index
    %3 = vector.load %arg3[%c0_4, %c0_5, %c0_6] : memref<1x4x384xbf16, #tpu.memory_space<vmem>>, vector<1x4x38xbf16>
    %4 = vector.shape_cast %3 : vector<1x4x38xbf16> to vector<4x38xbf16>
    %c0_7 = arith.constant 0 : index
    %c384 = arith.constant 384 : index
    %5 = vector.load %arg7[%c0_7, %c384] : memref<4x422xbf16, #tpu.memory_space<vmem>>, vector<4x38xbf16>
    tpu.vector_store %arg7[%c0_7, %c384], %4 {strides = array<i32>} : memref<4x422xbf16, #tpu.memory_space<vmem>>, vector<4x38xbf16>,
    %cst = arith.constant 0.000000e+00 : bf16
    %6 = vector.broadcast %cst : bf16 to vector<12x384xbf16>
    %c36 = arith.constant 36 : index
    %c0_8 = arith.constant 0 : index
    %7 = vector.load %arg8[%c36, %c0_8] : memref<48x384xbf16, #tpu.memory_space<vmem>>, vector<12x384xbf16>
    tpu.vector_store %arg8[%c36, %c0_8], %6 {strides = array<i32>} : memref<48x384xbf16, #tpu.memory_space<vmem>>, vector<12x384xbf16>,
    %c0_9 = arith.constant 0 : index
    %c0_10 = arith.constant 0 : index
    %8 = vector.load %arg7[%c0_9, %c0_10] : memref<4x422xbf16, #tpu.memory_space<vmem>>, vector<4x384xbf16>
    %c0_11 = arith.constant 0 : index
    %c0_12 = arith.constant 0 : index
    %9 = vector.load %arg8[%c0_11, %c0_12] : memref<48x384xbf16, #tpu.memory_space<vmem>>, vector<4x384xbf16>
    tpu.vector_store %arg8[%c0_11, %c0_12], %8 {strides = array<i32>} : memref<48x384xbf16, #tpu.memory_space<vmem>>, vector<4x384xbf16>,
    %c0_13 = arith.constant 0 : index
    %c1 = arith.constant 1 : index
    %10 = vector.load %arg7[%c0_13, %c1] : memref<4x422xbf16, #tpu.memory_space<vmem>>, vector<4x384xbf16>
    %c4 = arith.constant 4 : index
    %c0_14 = arith.constant 0 : index
    %11 = vector.load %arg8[%c4, %c0_14] : memref<48x384xbf16, #tpu.memory_space<vmem>>, vector<4x384xbf16>
    tpu.vector_store %arg8[%c4, %c0_14], %10 {strides = array<i32>} : memref<48x384xbf16, #tpu.memory_space<vmem>>, vector<4x384xbf16>,
    %c0_15 = arith.constant 0 : index
    %c2 = arith.constant 2 : index
    %12 = vector.load %arg7[%c0_15, %c2] : memref<4x422xbf16, #tpu.memory_space<vmem>>, vector<4x384xbf16>
    %c8 = arith.constant 8 : index
    %c0_16 = arith.constant 0 : index
    %13 = vector.load %arg8[%c8, %c0_16] : memref<48x384xbf16, #tpu.memory_space<vmem>>, vector<4x384xbf16>
    tpu.vector_store %arg8[%c8, %c0_16], %12 {strides = array<i32>} : memref<48x384xbf16, #tpu.memory_space<vmem>>, vector<4x384xbf16>,
    %c0_17 = arith.constant 0 : index
    %c18 = arith.constant 18 : index
    %14 = vector.load %arg7[%c0_17, %c18] : memref<4x422xbf16, #tpu.memory_space<vmem>>, vector<4x384xbf16>
    %c12 = arith.constant 12 : index
    %c0_18 = arith.constant 0 : index
    %15 = vector.load %arg8[%c12, %c0_18] : memref<48x384xbf16, #tpu.memory_space<vmem>>, vector<4x384xbf16>
    tpu.vector_store %arg8[%c12, %c0_18], %14 {strides = array<i32>} : memref<48x384xbf16, #tpu.memory_space<vmem>>, vector<4x384xbf16>,
    %c0_19 = arith.constant 0 : index
    %c19 = arith.constant 19 : index
    %16 = vector.load %arg7[%c0_19, %c19] : memref<4x422xbf16, #tpu.memory_space<vmem>>, vector<4x384xbf16>
    %c16 = arith.constant 16 : index
    %c0_20 = arith.constant 0 : index
    %17 = vector.load %arg8[%c16, %c0_20] : memref<48x384xbf16, #tpu.memory_space<vmem>>, vector<4x384xbf16>
    tpu.vector_store %arg8[%c16, %c0_20], %16 {strides = array<i32>} : memref<48x384xbf16, #tpu.memory_space<vmem>>, vector<4x384xbf16>,
    %c0_21 = arith.constant 0 : index
    %c20 = arith.constant 20 : index
    %18 = vector.load %arg7[%c0_21, %c20] : memref<4x422xbf16, #tpu.memory_space<vmem>>, vector<4x384xbf16>
    %c20_22 = arith.constant 20 : index
    %c0_23 = arith.constant 0 : index
    %19 = vector.load %arg8[%c20_22, %c0_23] : memref<48x384xbf16, #tpu.memory_space<vmem>>, vector<4x384xbf16>
    tpu.vector_store %arg8[%c20_22, %c0_23], %18 {strides = array<i32>} : memref<48x384xbf16, #tpu.memory_space<vmem>>, vector<4x384xbf16>,
    %c0_24 = arith.constant 0 : index
    %c36_25 = arith.constant 36 : index
    %20 = vector.load %arg7[%c0_24, %c36_25] : memref<4x422xbf16, #tpu.memory_space<vmem>>, vector<4x384xbf16>
    %c24 = arith.constant 24 : index
    %c0_26 = arith.constant 0 : index
    %21 = vector.load %arg8[%c24, %c0_26] : memref<48x384xbf16, #tpu.memory_space<vmem>>, vector<4x384xbf16>
    tpu.vector_store %arg8[%c24, %c0_26], %20 {strides = array<i32>} : memref<48x384xbf16, #tpu.memory_space<vmem>>, vector<4x384xbf16>,
    %c0_27 = arith.constant 0 : index
    %c37 = arith.constant 37 : index
    %22 = vector.load %arg7[%c0_27, %c37] : memref<4x422xbf16, #tpu.memory_space<vmem>>, vector<4x384xbf16>
    %c28 = arith.constant 28 : index
    %c0_28 = arith.constant 0 : index
    %23 = vector.load %arg8[%c28, %c0_28] : memref<48x384xbf16, #tpu.memory_space<vmem>>, vector<4x384xbf16>
    tpu.vector_store %arg8[%c28, %c0_28], %22 {strides = array<i32>} : memref<48x384xbf16, #tpu.memory_space<vmem>>, vector<4x384xbf16>,
    %c0_29 = arith.constant 0 : index
    %c38 = arith.constant 38 : index
    %24 = vector.load %arg7[%c0_29, %c38] : memref<4x422xbf16, #tpu.memory_space<vmem>>, vector<4x384xbf16>
    %c32 = arith.constant 32 : index
    %c0_30 = arith.constant 0 : index
    %25 = vector.load %arg8[%c32, %c0_30] : memref<48x384xbf16, #tpu.memory_space<vmem>>, vector<4x384xbf16>
    tpu.vector_store %arg8[%c32, %c0_30], %24 {strides = array<i32>} : memref<48x384xbf16, #tpu.memory_space<vmem>>, vector<4x384xbf16>,
    %c0_31 = arith.constant 0 : index
    %c0_32 = arith.constant 0 : index
    %26 = vector.load %arg4[%c0_31, %c0_32] : memref<8x48xbf16, #tpu.memory_space<vmem>>, vector<8x48xbf16>
    %c0_33 = arith.constant 0 : index
    %c0_34 = arith.constant 0 : index
    %27 = vector.load %arg8[%c0_33, %c0_34] : memref<48x384xbf16, #tpu.memory_space<vmem>>, vector<48x384xbf16>
    %cst_35 = arith.constant dense<0.000000e+00> : vector<8x384xf32>
    %28 = tpu.matmul %26, %27, %cst_35 {dimension_numbers = #tpu.dot_dimension_numbers<[1], [0], [0], [1], [0, 0, 1, 1], [], []>} : vector<8x48xbf16>, vector<48x384xbf16>, vector<8x384xf32> -> vector<8x384xf32>
    %c0_36 = arith.constant 0 : index
    %c0_37 = arith.constant 0 : index
    %29 = vector.load %arg5[%c0_36, %c0_37] : memref<8x1xf32, #tpu.memory_space<vmem>>, vector<8x1xf32>
    %30 = vector.broadcast %29 : vector<8x1xf32> to vector<8x384xf32>
    %31 = arith.addf %28, %30 : vector<8x384xf32>
    %cst_38 = arith.constant 0.000000e+00 : f32
    %32 = vector.broadcast %cst_38 : f32 to vector<8x384xf32>
    %33 = arith.maximumf %31, %32 : vector<8x384xf32>
    %c0_39 = arith.constant 0 : index
    %c0_40 = arith.constant 0 : index
    %c0_41 = arith.constant 0 : index
    %34 = vector.load %arg6[%c0_39, %c0_40, %c0_41] : memref<1x8x384xf32, #tpu.memory_space<vmem>>, vector<1x8x384xf32>
    %35 = vector.shape_cast %34 : vector<1x8x384xf32> to vector<8x384xf32>
    %36 = vector.shape_cast %33 : vector<8x384xf32> to vector<1x8x384xf32>
    tpu.vector_store %arg6[%c0_39, %c0_40, %c0_41], %36 {strides = array<i32>} : memref<1x8x384xf32, #tpu.memory_space<vmem>>, vector<1x8x384xf32>,
    return
  }
  func.func @transform_0(%arg0: i32, %arg1: i32) -> (i32, i32, i32) {
    %c0_i32 = arith.constant 0 : i32
    %c0_i32_0 = arith.constant 0 : i32
    return %arg0, %c0_i32, %arg1 : i32, i32, i32
  }
  func.func @transform_1(%arg0: i32, %arg1: i32) -> (i32, i32, i32) {
    %c1_i32 = arith.constant 1 : i32
    %0 = arith.addi %arg1, %c1_i32 : i32
    %c0_i32 = arith.constant 0 : i32
    %c0_i32_0 = arith.constant 0 : i32
    return %arg0, %c0_i32, %0 : i32, i32, i32
  }
  func.func @transform_2(%arg0: i32, %arg1: i32) -> (i32, i32) {
    %c0_i32 = arith.constant 0 : i32
    %c0_i32_0 = arith.constant 0 : i32
    %c0_i32_1 = arith.constant 0 : i32
    return %c0_i32, %c0_i32_0 : i32, i32
  }
  func.func @transform_3(%arg0: i32, %arg1: i32) -> (i32, i32) {
    %c0_i32 = arith.constant 0 : i32
    %c0_i32_0 = arith.constant 0 : i32
    %c0_i32_1 = arith.constant 0 : i32
    return %c0_i32, %c0_i32_0 : i32, i32
  }
  func.func @transform_4(%arg0: i32, %arg1: i32) -> (i32, i32, i32) {
    %c0_i32 = arith.constant 0 : i32
    %c0_i32_0 = arith.constant 0 : i32
    return %arg0, %c0_i32, %arg1 : i32, i32, i32
  }
}

</mosaic_0001>

<bundles_post_ra>
// kernel: tpu_custom_call.1
= control target key start
LH: loop header
LB: loop body
LE: loop exit
PB: predicated region body
PF: predicated region fallthrough
CT: control target
= control target key end

     0   :  { %9 = vsyncpa [#allocation5], 0  ;;  %s1240_s0 = inlined_call_operand.hbm [shape: bf16[2,4,768], index: 0, kind: input, shape index: {}]   ;;  %s1241_s1 = inlined_call_operand.hbm [shape: bf16[2,4,768], index: 1, kind: input, shape index: {}]   ;;  %s1242_s2 = inlined_call_operand.vmem [shape: bf16[8,48], index: 2, kind: input, shape index: {}]   ;;  %s1243_s3 = inlined_call_operand.vmem [shape: f32[8,1], index: 3, kind: input, shape index: {}]   ;;  %s1244_s4 = inlined_call_operand.hbm [shape: f32[2,8,384], index: 4, kind: output, shape index: {}]  }
   0x1   :  { %11 = vsyncpa [#allocation5 + $0x1], 0 }
   0x2   :  { %12 = vsyncpa [#allocation8], 0 }
   0x3   :  { %14 = vsyncpa [#allocation8 + $0x1], 0 }
   0x4   :  { %15 = vsyncpa [#allocation6], 0 }
   0x5   :  { %17 = vsyncpa [#allocation6 + $0x1], 0  ;;  %s1047_s15 = smov 0   ;;  %s1049_s16 = smov 0  }
   0x6   :  { %s1051_s17 = smov 0   ;;  %s1053_s18 = smov 0  }
   0x7   :  { %s1055_s19 = smov 0   ;;  %s1057_s20 = smov 0  }
   0x8 LB: > { %1247 = sst [smem:[#allocation13_spill]] %s1007_s19  ;;  %s723_s21 = sadd.s32 4294967295, %s1011_s20   ;;  %s1011_s20 = sphi %s1057_s20, %s23_s20   ;;  %s1007_s19 = sphi %s1055_s19, %s1255_s19   ;;  %s1003_s18 = sphi %s1053_s18, %s1254_s18   ;;  %s999_s17 = sphi %s1051_s17, %s1258_s17   ;;  %s995_s16 = sphi %s1049_s16, %s1257_s16   ;;  %s991_s15 = sphi %s1047_s15, %s1256_s15  }
   0x9   : > { %s724_s22 = sadd.s32 4294967294, %s1011_s20   ;;  %s35_s23 = sadd.s32 1, %s1007_s19 }
   0xa   : > { %s44_s24 = sadd.s32 1, %s999_s17  ;;  %p37_p0 = scmp.ge.s32.totalorder %s35_s23, 2 }
   0xb   : > { %p51_p1 = scmp.ne.s32.totalorder %s999_s17, %s995_s16  ;;  %p52_p2 = scmp.eq.s32.totalorder %s1011_s20, 0 }
   0xc   : > { %p57_p3 = scmp.ne.s32.totalorder %s995_s16, %s991_s15  ;;  %s1260_s23 = smov (%p37_p0, %s35_s23), 0 }
   0xd   : > { %1248 = sst [smem:[#allocation14_spill]] %s1260_s23  ;;  %p1088_p4 = por %p52_p2, %p51_p1 }
   0xe   : > { %p58_p5 = scmp.eq.s32.totalorder %s723_s21, 0  ;;  %s39_s26 = ssub.s32 %s1007_s19, %s1260_s23 }
   0xf   : > { %p155_p6 = scmp.eq.s32.totalorder %s723_s21, 1  ;;  %p42_p7 = scmp.eq.s32.totalorder %s39_s26, 0 }
  0x10   : > { %p1094_p8 = por %p58_p5, %p57_p3  ;;  %p161_p10 = scmp.eq.s32.totalorder %s724_s22, 1 }
  0x11   : > { %p1098_p9 = por %p155_p6, %p51_p1  ;;  %p726_p12 = scmp.ge.s32.totalorder %s1011_s20, 2 }
  0x12   : > { %s1103_s29 = scalar_select %p42_p7, %s999_s17, %s44_s24  }
  0x13   : > { %p1105_p11 = por %p161_p10, %p57_p3  ;;  %p804_p13 = scmp.lt.s32.totalorder %s1011_s20, 2 }
  0x14   : > { %s187_s5 = sand.u32 1, %s999_s17   ;;  %s782_s7 = smul.u32 12, %s1007_s19 }
  0x15   : > { %s781_s6 = smul.u32 6, %s187_s5  ;;  %p1115_p0 = pnand %p804_p13, %p1088_p4 }
  0x16   : > { %p729_p1 = scmp.ge.s32.totalorder %s1011_s20, 1  ;;  %s198_s11 = scalar_lea.hbm %s1240_s0, %s782_s7 }
  0x17   : > { %s191_s12 = scalar_lea.vmem [#allocation4], %s781_s6  ;;  %s200_s14 = sshll.u32 %s198_s11, 4  ;;  %s201_s14 = int_to_ptr.hbm [resolvable:$true] %s200_s14 }
  0x18   : > { %s202_s13 = sshll.u32 %s191_s12, 4  ;;  %s188_s21 = scalar_lea.sflag [#allocation5], %s187_s5  ;;  %s203_s13 = int_to_ptr.vmem [resolvable:$true] %s202_s13 }
  0x19   : > { %796 = dma.hbm_to_vmem [thread:$0]  (!%p1115_p0), %s201_s14, 96, %s203_s13, %s188_s21  }
  0x1a   : > { %p230_p2 = scmp.lt.s32.totalorder %s1011_s20, 3  ;;  %s654_s25 = scalar_lea.hbm %s1241_s1, %s782_s7 }
  0x1b   : > { %s655_s26 = scalar_lea.hbm %s654_s25, 6  ;;  %s213_s19 = scalar_lea.vmem [#allocation7], %s781_s6 }
  0x1c   : > { %p231_p3 = pnand %p729_p1, %p230_p2  ;;  %s223_s23 = sshll.u32 %s655_s26, 4  ;;  %s224_s23 = int_to_ptr.hbm [resolvable:$true] %s223_s23 }
  0x1d   : > { %s225_s9 = sshll.u32 %s213_s19, 4  ;;  %s210_s10 = scalar_lea.sflag [#allocation8], %s187_s5  ;;  %s226_s9 = int_to_ptr.vmem [resolvable:$true] %s225_s9 }
  0x1e   : > { %799 = dma.hbm_to_vmem [thread:$0]  (!%p1115_p0), %s224_s23, 96, %s226_s9, %s210_s10  }
  0x1f   : > { %234 = sbr.rel (%p231_p3) target bundleno = 402 (0x192), region = 36  ;;  %s1132_s11 = sand.u32 (!%p231_p3), 1, %s995_s16  }
  0x20   : > { %s784_s12 = smul.u32 (!%p231_p3), 6, %s1132_s11  ;;  %s237_s13 = scalar_lea.sflag (!%p231_p3), [#allocation5], %s1132_s11 }
  0x22   : > { %s240_s7 = scalar_lea.vmem (!%p231_p3), [#allocation4], %s784_s12 }
  0x24   : > { %978 = dma.done.wait (%p1094_p8), %s237_s13, 96  }
  0x25   : > { %980 = vsyncadd (%p1094_p8), %s237_s13, 4294967200  ;;  %s247_s19 = scalar_lea.sflag [#allocation8], %s1132_s11  ;;  %s250_s5 = scalar_lea.vmem [#allocation7], %s784_s12 }
  0x26   : > { %982 = dma.done.wait (%p1094_p8), %s247_s19, 96  }
  0x27   : > { %984 = vsyncadd (%p1094_p8), %s247_s19, 4294967200  ;;  %vm289_vm0 = vcmask 304128   ;;  %v286_v0 = vld [vmem:[%s240_s7] sm:$0x3f]  ;;  %v288_v1 = vld [vmem:[%s250_s5] sm:$0x3] }
  0x28   : > { %287 = vst [vmem:[#allocation2] sm:$0x3f] %v286_v0  ;;  %s1013_s23 = smov 127   ;;  %s1014_s27 = smov 126   ;;  %vm363_vm1 = vcmask 900096   ;;  %vm320_vm2 = vcmask 1039360  }
  0x29   : > { %290 = vst.msk [vmem:[#allocation2 + $0x6] sm:$0x3] %vm289_vm0, %v288_v1  ;;  %s1015_s6 = smov 110   ;;  %s1016_s8 = smov 109   ;;  %vm341_vm3 = vcmask 1031168   ;;  %vm449_vm4 = vcmask 744448  }
  0x2a   : > { %s1017_s14 = smov 108   ;;  %s1018_s21 = smov 92   ;;  %vm384_vm5 = vcmask 891904   ;;  %v1021_v38 = vmov 0   ;;  %vm406_vm6 = vcmask 883712   ;;  %vm318_vm7 = vcmask 1043456  }
  0x2b   : > { %s1019_s22 = smov 91   ;;  %s1020_s24 = smov 90   ;;  %863 = vset.pattern.permute.xlu1 %v1021_v38  ;;  %864 = vset.pattern.permute.xlu0 %v1021_v38  ;;  %292 = vst [vmem:[#allocation3 + $0x38] sm:$0xc] %v1021_v38  ;;  %vm427_vm8 = vcmask 752640   ;;  %vm470_vm9 = vcmask 736256  }
  0x2c   : > { %294 = vst [vmem:[#allocation3 + $0x44] sm:$0xf] %v1021_v38  ;;  %vm544_vm10 = vcmask 392192   ;;  %s785_s12 = smul.u32 24, %s1132_s11 }
  0x2d   : > { %291 = vst [vmem:[#allocation3 + $0x30] sm:$0xcc] %v1021_v38  ;;  %s786_s13 = smul.u32 24, %s1003_s18  ;;  %s594_s18 = scalar_lea.sflag [#allocation6], %s1132_s11 }
  0x2e   : > { %293 = vst [vmem:[#allocation3 + $0x3c] sm:$0xff] %v1021_v38 }
  0x2f   : > { %v295_v2 = vld [vmem:[#allocation2] sm:$0x3f]  ;;  %s607_s5 = scalar_lea.hbm %s1244_s4, %s786_s13 }
  0x30   : > { %297 = vst [vmem:[#allocation1] ss:$2 sm:$0xff] %v295_v2  ;;  %v304_v3 = vld [vmem:[#allocation2] sm:$0xff]  ;;  %v490_v2 = vld [vmem:[%s1243_s3] sm:$0xff] }
  0x37   : > { %v298_v4 = vld.sshfl [vmem:[#allocation1] sm:$0xff pattern:$0x75643120]  ;;  %v299_v5 = vld.sshfl [vmem:[#allocation1 + $0x8] sm:$0xff pattern:$0x75643120] }
  0x38   : > { %307 = vst [vmem:[#allocation1 + $0x1] ss:$2 sm:$0xff] %v304_v3 }
  0x39   : > { %302 = vst [vmem:[#allocation3] sm:$0x33] %v298_v4 }
  0x3a   : > { %303 = vst [vmem:[#allocation3 + $0x8] sm:$0x3] %v299_v5 }
  0x3f   : > { %v310_v6 = vld.sshfl [vmem:[#allocation1 + $0x8] sm:$0xff pattern:$0x75643120]  ;;  %v308_v7 = vld.sshfl [vmem:[#allocation1] sm:$0xff pattern:$0x75643120] }
  0x40   : > { %314 = vrot.lane.b32.xlu0 %v310_v6, %s1013_s23  ;;  %329 = vst [vmem:[#allocation1] ss:$2 sm:$0xff] %v304_v3 }
  0x47   : > { %v332_v8 = vld.sshfl [vmem:[#allocation1 + $0x8] sm:$0xff pattern:$0x75643120]  ;;  %v330_v9 = vld.sshfl [vmem:[#allocation1] sm:$0xff pattern:$0x75643120] }
  0x48   : > { %336 = vrot.lane.b32.xlu1 %v332_v8, %s1014_s27  ;;  %351 = vst [vmem:[#allocation1 + $0x1] ss:$2 sm:$0xff] %v304_v3 }
  0x4f   : > { %v352_v10 = vld.sshfl [vmem:[#allocation1] sm:$0xff pattern:$0x75643120]  ;;  %v354_v11 = vld.sshfl [vmem:[#allocation1 + $0x8] sm:$0xff pattern:$0x75643120] }
  0x50   : > { %358 = vrot.lane.b32.xlu2 %v354_v11, %s1015_s6  ;;  %372 = vst [vmem:[#allocation1] ss:$2 sm:$0xff] %v304_v3 }
  0x57   : > { %v375_v12 = vld.sshfl [vmem:[#allocation1 + $0x8] sm:$0xff pattern:$0x75643120]  ;;  %v373_v13 = vld.sshfl [vmem:[#allocation1] sm:$0xff pattern:$0x75643120] }
  0x58   : > { %379 = vrot.lane.b32.xlu0 %v375_v12, %s1016_s8  ;;  %394 = vst [vmem:[#allocation1 + $0x1] ss:$2 sm:$0xff] %v304_v3 }
  0x5f   : > { %v397_v14 = vld.sshfl [vmem:[#allocation1 + $0x8] sm:$0xff pattern:$0x75643120]  ;;  %v395_v15 = vld.sshfl [vmem:[#allocation1] sm:$0xff pattern:$0x75643120] }
  0x60   : > { %401 = vrot.lane.b32.xlu1 %v397_v14, %s1017_s14  ;;  %377 = vrot.lane.b32.xlu0 %v373_v13, %s1016_s8  ;;  %415 = vst [vmem:[#allocation1] ss:$2 sm:$0xff] %v304_v3  ;;  %v779_v13 = vld [vmem:[#allocation3 + $0x38] sm:$0xf0]  ;;  %v758_v14 = vld [vmem:[#allocation3 + $0x3c] sm:$0xf0] }
  0x67   : > { %v418_v16 = vld.sshfl [vmem:[#allocation1 + $0x8] sm:$0xff pattern:$0x75643120]  ;;  %v416_v17 = vld.sshfl [vmem:[#allocation1] sm:$0xff pattern:$0x75643120] }
  0x68   : > { %422 = vrot.lane.b32.xlu1 %v418_v16, %s1018_s21  ;;  %420 = vrot.lane.b32.xlu2 %v416_v17, %s1018_s21  ;;  %437 = vst [vmem:[#allocation1 + $0x1] ss:$2 sm:$0xff] %v304_v3 }
  0x6f   : > { %v438_v18 = vld.sshfl [vmem:[#allocation1] sm:$0xff pattern:$0x75643120]  ;;  %v440_v19 = vld.sshfl [vmem:[#allocation1 + $0x8] sm:$0xff pattern:$0x75643120] }
  0x70   : > { %399 = vrot.lane.b32.xlu1 %v395_v15, %s1017_s14  ;;  %444 = vrot.lane.b32.xlu2 %v440_v19, %s1019_s22  ;;  %458 = vst [vmem:[#allocation1] ss:$2 sm:$0xff] %v304_v3 }
  0x77   : > { %v461_v20 = vld.sshfl [vmem:[#allocation1 + $0x8] sm:$0xff pattern:$0x75643120]  ;;  %v459_v21 = vld.sshfl [vmem:[#allocation1] sm:$0xff pattern:$0x75643120] }
  0x78   : > { %312 = vrot.lane.b32.xlu1 %v308_v7, %s1013_s23  ;;  %465 = vrot.lane.b32.xlu0 %v461_v20, %s1020_s24  ;;  %s280_s23 = scalar_lea.vmem [#allocation9], %s785_s12 }
  0x79   : > { %463 = vrot.lane.b32.xlu2 %v459_v21, %s1020_s24  ;;  %s945_s24 = scalar_lea.hbm %s1244_s4, 48 }
  0x80   : > { %442 = vrot.lane.b32.xlu0 %v438_v18, %s1019_s22  ;;  %493 = vperm.xlu1 %863, %v490_v2  }
  0x81   : > { %334 = vrot.lane.b32.xlu2 %v330_v9, %s1014_s27  ;;  %s609_s27 = sshll.u32 %s280_s23, 4  ;;  %s610_s27 = int_to_ptr.vmem [resolvable:$true] %s609_s27 }
  0x88   : > { %356 = vrot.lane.b32.xlu0 %v352_v10, %s1015_s6  ;;  %v780_v10 = vld [vmem:[#allocation3 + $0x40] sm:$0xf0]  ;;  %s611_s6 = sshll.u32 %s607_s5, 4  ;;  %s612_s6 = int_to_ptr.hbm [resolvable:$true] %s611_s6 }
  0x89   : > { %s939_s8 = sshra.s32 %s612_s6, 4  ;;  %s940_s8 = int_to_ptr.hbm [resolvable:$true] %s939_s8 }
  0x8a   : > { %s941_s14 = scalar_lea.hbm %s940_s8, 24  ;;  %p946_p7 = scmp.lt.s32.totalorder %s940_s8, %s1244_s4 }
  0x8b   : > { %p942_p4 = scmp.ne.s32.totalorder %s940_s8, %s941_s14  ;;  %p947_p8 = scmp.lt.s32.totalorder %s945_s24, %s941_s14 }
  0x8d   : > { %p943_p5 = pnand %p942_p4, %p1098_p9  ;;  %p948_p10 = por %p947_p8, %p946_p7 }
  0x8f   : > { %p944_p6 = pneg %p943_p5 }
  0x91   : > { %p949_p13 = pnand %p948_p10, %p944_p6 }
  0xaa   : > { %v1151_v22 = vpop.permute.xlu2 %358 }
  0xab   : > { %v361_v23 = vrot.slane %v1151_v22, 4 }
  0xad   : > { %v365_v24 = vsel %vm363_vm1, %v1151_v22, %v361_v23 }
  0xae   : > { %369 = vst [vmem:[#allocation3 + $0x14] sm:$0xc] %v365_v24 }
  0xb2   : > { %v1158_v25 = vpop.permute.xlu0 %314 }
  0xb3   : > { %v317_v26 = vrot.slane %v1158_v25, 4 }
  0xb5   : > { %v322_v27 = vsel %vm320_vm2, %v1158_v25, %v317_v26 }
  0xb6   : > { %326 = vst [vmem:[#allocation3 + $0x8] sm:$0xc] %v322_v27 }
  0xba   : > { %v337_v28 = vpop.permute.xlu1 %336 }
  0xbb   : > { %v339_v29 = vrot.slane %v337_v28, 4 }
  0xbd   : > { %v343_v30 = vsel %vm341_vm3, %v337_v28, %v339_v29  ;;  %v740_v28 = vld [vmem:[#allocation3 + $0x8] sm:$0xf] }
  0xbe   : > { %347 = vst [vmem:[#allocation3 + $0x14] sm:$0x3] %v343_v30 }
  0xc2   : > { %v421_v31 = vpop.permute.xlu2 %420 }
  0xc3   : > { %v424_v47 = vrot.slane %v421_v31, 4 }
  0xca   : > { %v1166_v32 = vpop.permute.xlu2 %444  ;;  %v380_v33 = vpop.permute.xlu0 %379 }
  0xcb   : > { %v447_v34 = vrot.slane %v1166_v32, 4  ;;  %v382_v35 = vrot.slane %v380_v33, 4 }
  0xcd   : > { %v451_v36 = vsel %vm449_vm4, %v1166_v32, %v447_v34  ;;  %v386_v37 = vsel %vm384_vm5, %v380_v33, %v382_v35 }
  0xce   : > { %455 = vst [vmem:[#allocation3 + $0x2c] sm:$0xc] %v451_v36 }
  0xcf   : > { %390 = vst [vmem:[#allocation3 + $0x20] sm:$0x3] %v386_v37 }
  0xd2   : > { %v402_v39 = vpop.permute.xlu1 %401  ;;  %v378_v40 = vpop.permute.xlu0 %377 }
  0xd3   : > { %v404_v41 = vrot.slane %v402_v39, 4  ;;  %v464_v42 = vpop.permute.xlu2 %463  ;;  %v381_v43 = vrot.slane %v378_v40, 4 }
  0xd4   : > { %v467_v61 = vrot.slane %v464_v42, 4 }
  0xd5   : > { %v408_v44 = vsel %vm406_vm6, %v402_v39, %v404_v41  ;;  %v383_v45 = vsel %vm318_vm7, %v381_v43, %v382_v35  ;;  %v477_v39 = vld [vmem:[%s1242_s2] sm:$0xf] }
  0xd6   : > { %412 = vst [vmem:[#allocation3 + $0x20] sm:$0xc] %v408_v44  ;;  %v385_v46 = vsel %vm384_vm5, %v378_v40, %v383_v45 }
  0xd7   : > { %389 = vst [vmem:[#allocation3 + $0x18] sm:$0x33] %v385_v46 }
  0xda   : > { %v423_v48 = vpop.permute.xlu1 %422 }
  0xdb   : > { %v425_v49 = vrot.slane %v423_v48, 4  ;;  %v335_v50 = vpop.permute.xlu2 %334 }
  0xdc   : > { %v338_v51 = vrot.slane %v335_v50, 4 }
  0xdd   : > { %v426_v52 = vsel %vm318_vm7, %v424_v47, %v425_v49  ;;  %v429_v53 = vsel %vm427_vm8, %v423_v48, %v425_v49  ;;  %v752_v24 = vld [vmem:[#allocation3 + $0x20] sm:$0xf] }
  0xde   : > { %v428_v54 = vsel %vm427_vm8, %v421_v31, %v426_v52  ;;  %433 = vst [vmem:[#allocation3 + $0x2c] sm:$0x3] %v429_v53  ;;  %v340_v55 = vsel %vm318_vm7, %v338_v51, %v339_v29  ;;  %v774_v29 = vld [vmem:[#allocation3 + $0x10] sm:$0xf0] }
  0xdf   : > { %432 = vst [vmem:[#allocation3 + $0x24] sm:$0x33] %v428_v54  ;;  %v342_v56 = vsel %vm341_vm3, %v335_v50, %v340_v55  ;;  %v741_v33 = vor.u32 %v774_v29, %v740_v28 }
  0xe0   : > { %346 = vst [vmem:[#allocation3 + $0xc] sm:$0x33] %v342_v56 }
  0xe2   : > { %v400_v57 = vpop.permute.xlu1 %399 }
  0xe3   : > { %v403_v58 = vrot.slane %v400_v57, 4 }
  0xe5   : > { %v405_v59 = vsel %vm318_vm7, %v403_v58, %v404_v41  ;;  %v777_v17 = vld [vmem:[#allocation3 + $0x28] sm:$0xf0] }
  0xe6   : > { %v407_v60 = vsel %vm406_vm6, %v400_v57, %v405_v59 }
  0xe7   : > { %411 = vst [vmem:[#allocation3 + $0x18] sm:$0xcc] %v407_v60 }
  0xea   : > { %v313_v62 = vpop.permute.xlu1 %312  ;;  %v466_v63 = vpop.permute.xlu0 %465 }
  0xeb   : > { %v316_v0 = vrot.slane %v313_v62, 4  ;;  %v468_v1 = vrot.slane %v466_v63, 4 }
  0xed   : > { %v319_v3 = vsel %vm318_vm7, %v316_v0, %v317_v26  ;;  %v469_v4 = vsel %vm318_vm7, %v467_v61, %v468_v1  ;;  %v472_v5 = vsel %vm470_vm9, %v466_v63, %v468_v1  ;;  %v753_v26 = vor.u32 %v777_v17, %v752_v24 }
  0xee   : > { %v321_v6 = vsel %vm320_vm2, %v313_v62, %v319_v3  ;;  %v471_v7 = vsel %vm470_vm9, %v464_v42, %v469_v4  ;;  %476 = vst [vmem:[#allocation3 + $0x38] sm:$0x3] %v472_v5  ;;  %v744_v31 = vld [vmem:[#allocation3 + $0x18] sm:$0xf]  ;;  %v775_v35 = vld [vmem:[#allocation3 + $0x1c] sm:$0xf] }
  0xef   : > { %325 = vst [vmem:[#allocation3] sm:$0xcc] %v321_v6 }
  0xf0   : > { %475 = vst [vmem:[#allocation3 + $0x30] sm:$0x33] %v471_v7 }
  0xf2   : > { %v443_v8 = vpop.permute.xlu0 %442  ;;  %v494_v44 = vpop.permute.xlu1 %493 }
  0xf3   : > { %v446_v9 = vrot.slane %v443_v8, 4 }
  0xf5   : > { %v448_v11 = vsel %vm318_vm7, %v446_v9, %v447_v34  ;;  %v764_v12 = vld [vmem:[#allocation3 + $0x38] sm:$0xf] }
  0xf6   : > { %v450_v15 = vsel %vm449_vm4, %v443_v8, %v448_v11  ;;  %v765_v16 = vor.u32 %v780_v10, %v764_v12  ;;  %v732_v22 = vld [vmem:[#allocation3] sm:$0xf]  ;;  %v772_v40 = vld [vmem:[#allocation3 + $0x4] sm:$0xf] }
  0xf7   : > { %454 = vst [vmem:[#allocation3 + $0x24] sm:$0xcc] %v450_v15  ;;  %v756_v18 = vld [vmem:[#allocation3 + $0x30] sm:$0xf]  ;;  %v778_v19 = vld [vmem:[#allocation3 + $0x34] sm:$0xf] }
  0xf8   : > { %579 = vmatpush.bf16.msra.mxu2 %v765_v16  ;;  %v757_v20 = vor.u32 %v779_v13, %v756_v18  ;;  %v761_v21 = vor.u32 %v778_v19, %v758_v14 }
  0xfa   : > { %553 = vmatpush.bf16.msra.mxu0 %v757_v20  ;;  %566 = vmatpush.bf16.msra.mxu1 %v761_v21  ;;  %v357_v25 = vpop.permute.xlu0 %356 }
  0xfb   : > { %v360_v27 = vrot.slane %v357_v25, 4 }
  0xfc   : > { %580 = vmatpush.bf16.msra.mxu2 %v753_v26 }
  0xfd   : > { %v362_v30 = vsel %vm318_vm7, %v360_v27, %v361_v23 }
  0xfe   : > { %v364_v32 = vsel %vm363_vm1, %v357_v25, %v362_v30  ;;  %v776_v34 = vld [vmem:[#allocation3 + $0x20] sm:$0xf0]  ;;  %v746_v36 = vld [vmem:[#allocation3 + $0x24] sm:$0xf0] }
  0xff   : > { %368 = vst [vmem:[#allocation3 + $0xc] sm:$0xcc] %v364_v32  ;;  %v745_v37 = vor.u32 %v776_v34, %v744_v31  ;;  %v749_v38 = vor.u32 %v775_v35, %v746_v36 }
 0x100   : > { %581 = vmatpush.bf16.msra.mxu2 %v741_v33 }
 0x101   : > { %554 = vmatpush.bf16.msra.mxu0 %v745_v37  ;;  %567 = vmatpush.bf16.msra.mxu1 %v749_v38 }
 0x103   : > { %768 = vmatmul.msk.bf16.vlgmr.msra.gmra.mxu2 %vm544_vm10, %v477_v39 }
 0x106   : > { %v773_v23 = vld [vmem:[#allocation3 + $0x8] sm:$0xf0]  ;;  %v734_v41 = vld [vmem:[#allocation3 + $0xc] sm:$0xf0] }
 0x107   : > { %v733_v42 = vor.u32 %v773_v23, %v732_v22  ;;  %v737_v43 = vor.u32 %v772_v40, %v734_v41 }
 0x109   : > { %555 = vmatpush.bf16.msra.mxu0 %v733_v42  ;;  %568 = vmatpush.bf16.msra.mxu1 %v737_v43 }
 0x10c   : > { %766 = vmatmul.msk.bf16.vlgmr.msra.gmra.mxu0 %vm544_vm10, %v477_v39  ;;  %767 = vmatmul.msk.bf16.vlgmr.msra.gmra.mxu1 %vm544_vm10, %v477_v39 }
 0x186   : > { %v583_v45 = vpop.f32.mrf.mxu2 }
 0x187   : > { %v584_v46 = vadd.f32 %v583_v45, %v494_v44 }
 0x189   : > { %v589_v47 = vmax.f32 %v584_v46, 0.0  ;;  %v557_v48 = vpop.f32.mrf.mxu0  ;;  %v570_v49 = vpop.f32.mrf.mxu1 }
 0x18a   : > { %v558_v50 = vadd.f32 %v557_v48, %v494_v44  ;;  %v571_v51 = vadd.f32 %v570_v49, %v494_v44 }
 0x18b   : > { %592 = vst [vmem:[%s280_s23 + $0x10] sm:$0xff] %v589_v47 }
 0x18c   : > { %v587_v52 = vmax.f32 %v558_v50, 0.0  ;;  %v588_v53 = vmax.f32 %v571_v51, 0.0 }
 0x18e   : > { %590 = vst [vmem:[%s280_s23] sm:$0xff] %v587_v52  ;;  %v585_v54 = vpop.f32.mrf.mxu2 }
 0x18f   : > { %591 = vst [vmem:[%s280_s23 + $0x8] sm:$0xff] %v588_v53 }
 0x190   : > { %952 = shalt.err (!%p949_p13)
}
 0x191   : > { %791 = dma.vmem_to_hbm [thread:$0]  (%p1098_p9), %s610_s27, 384, %s612_s6, %s594_s18   ;;  %v559_v55 = vpop.f32.mrf.mxu0  ;;  %v572_v56 = vpop.f32.mrf.mxu1 }
 0x192 PF: > { %s623_s11 = sand.u32 1, %s991_s15   ;;  %p801_p0 = pnand %p726_p12, %p1105_p11 }
 0x193   : > { %s624_s9 = scalar_lea.sflag [#allocation6], %s623_s11 }
 0x194   : > { %p802_p1 = pneg %p801_p0 }
 0x196   : > { %986 = dma.done.wait (%p802_p1), %s624_s9, 384  }
 0x197   : > { %988 = vsyncadd (%p802_p1), %s624_s9, 4294966912  ;;  %s23_s20 = sadd.s32 1, %s1011_s20   ;;  %s1254_s18 = sld [smem:[#allocation13_spill]] }
 0x198   : > { %p20_p2 = scmp.ge.s32.totalorder %s23_s20, 4   ;;  %s1255_s19 = sld [smem:[#allocation14_spill]] }
 0x199   : > { %s1256_s15 = smov %s995_s16  ;;  %s1257_s16 = smov %s999_s17 }
 0x19a   : > { %s1258_s17 = smov %s1103_s29  ;;  %22 = sbr.rel (!%p20_p2) target bundleno = 8 (0x8), region = 98 }
 0x19f   :  { %630 = vsyncpa [#allocation5], 1 }
 0x1a0   :  { %632 = vsyncpa [#allocation5 + $0x1], 1 }
 0x1a1   :  { %633 = vsyncpa [#allocation8], 1 }
 0x1a2   :  { %635 = vsyncpa [#allocation8 + $0x1], 1 }
 0x1a3   :  { %636 = vsyncpa [#allocation6], 1 }
 0x1a4   :  { %638 = vsyncpa [#allocation6 + $0x1], 1 }

</bundles_post_ra>
